<compile_context>
chip_gen: v7x
topology: tpu7x:2x2x1
jax: 0.10.0
libtpu: 0.0.40
codegen_flags: <defaults>
</compile_context>

<pallas_src>
import functools

import jax
import jax.numpy as jnp
from jax.experimental import pallas as pl
from jax.experimental.pallas import tpu as pltpu

_LANES = 128
_SUBLANES = 8
_TILE_ELEMS = _LANES * _SUBLANES          # 1024: minimum f32 tile
_DEFAULT_BLOCK_ROWS = 8192                # (8192, 128) f32 block = 4 MiB


@functools.lru_cache(maxsize=1)
def _tensorcores_per_device():
    """Best-effort count of TensorCores behind one JAX device.

    v2/v3 expose one core per device; v5e/v6e ("lite") have a single TC per
    chip.  v4/v5p (megacore) and v7x have two TCs that `"parallel"` grid axes
    can shard across.  Unknown chips default to 2 (a size-2 leading axis is a
    harmless sequential loop on single-TC hardware).
    """
    try:
        kind = jax.devices()[0].device_kind.lower()
    except Exception:  # pragma: no cover - defensive
        return 2
    if ("lite" in kind or "v5e" in kind or "v6e" in kind
            or "v2" in kind or "v3" in kind):
        return 1
    return 2


def _mcc_stats_kernel(yt_ref, yp_ref, acc_ref, *, rows, block_rows, steps,
                      num_blocks, needs_mask):
    """Accumulates per-lane partial sums of yt*yp, yt, yp into acc_ref.

    acc_ref block: (1, 3, 8, 128) f32, resident across the inner grid axis.
    """
    c = pl.program_id(0)
    i = pl.program_id(1)

    @pl.when(i == 0)
    def _init():
        acc_ref[...] = jnp.zeros_like(acc_ref)

    k = block_rows // _SUBLANES

    def accumulate(yt, yp):
        prod = yt * yp
        acc_ref[0, 0] += prod.reshape(k, _SUBLANES, _LANES).sum(axis=0)
        acc_ref[0, 1] += yt.reshape(k, _SUBLANES, _LANES).sum(axis=0)
        acc_ref[0, 2] += yp.reshape(k, _SUBLANES, _LANES).sum(axis=0)

    if not needs_mask:
        accumulate(yt_ref[...].astype(jnp.float32),
                   yp_ref[...].astype(jnp.float32))
    else:
        logical_block = c * steps + i
        is_tail = logical_block >= (num_blocks - 1)

        # Interior blocks: unmasked fast path (no iota / selects).
        @pl.when(jnp.logical_not(is_tail))
        def _interior():
            accumulate(yt_ref[...].astype(jnp.float32),
                       yp_ref[...].astype(jnp.float32))

        # Tail / clamped-overshoot blocks: rows at/after `rows` are either
        # Pallas edge padding (unspecified) or a re-read of the last valid
        # block (clamped index map); zero them out of *both* operands.
        @pl.when(is_tail)
        def _tail():
            yt = yt_ref[...].astype(jnp.float32)
            yp = yp_ref[...].astype(jnp.float32)
            row_ids = jax.lax.broadcasted_iota(
                jnp.int32, (block_rows, _LANES), 0)
            valid = (logical_block * block_rows + row_ids) < rows
            accumulate(jnp.where(valid, yt, 0.0),
                       jnp.where(valid, yp, 0.0))


def _kernel_partial_sums(yt2d, yp2d, block_rows):
    """Runs the streaming-reduction kernel; returns (tp, sum_t, sum_p) f32."""
    rows = yt2d.shape[0]                              # multiple of 8
    block_rows = min(block_rows, rows)                # multiple of 8 or == rows
    num_blocks = pl.cdiv(rows, block_rows)
    num_splits = _tensorcores_per_device() if num_blocks >= 2 else 1
    steps = pl.cdiv(num_blocks, num_splits)
    needs_mask = (num_splits * steps * block_rows) != rows

    if needs_mask:
        def in_map(c, i):
            # Clamp so an overshooting logical block re-reads valid data;
            # the in-kernel mask zeroes its contribution.
            return (jnp.minimum(c * steps + i, num_blocks - 1), 0)
    else:
        def in_map(c, i):
            return (c * steps + i, 0)

    kernel = functools.partial(
        _mcc_stats_kernel,
        rows=rows, block_rows=block_rows, steps=steps,
        num_blocks=num_blocks, needs_mask=needs_mask)

    bytes_accessed = (yt2d.size * yt2d.dtype.itemsize
                      + yp2d.size * yp2d.dtype.itemsize
                      + num_splits * 3 * _SUBLANES * _LANES * 4)

    # v5e's default scoped-VMEM limit (16 MiB) is too small for 4 MiB blocks
    # double-buffered on two inputs plus f32 temporaries; 40 MiB is safe on
    # every generation (v7x physical VMEM is 64 MiB per TC).
    vmem_limit = (40 << 20) if block_rows > 2048 else None

    acc = pl.pallas_call(
        kernel,
        out_shape=jax.ShapeDtypeStruct(
            (num_splits, 3, _SUBLANES, _LANES), jnp.float32),
        grid_spec=pltpu.PrefetchScalarGridSpec(
            num_scalar_prefetch=0,
            grid=(num_splits, steps),
            in_specs=[
                pl.BlockSpec((block_rows, _LANES), in_map),
                pl.BlockSpec((block_rows, _LANES), in_map),
            ],
            out_specs=pl.BlockSpec(
                (1, 3, _SUBLANES, _LANES), lambda c, i: (c, 0, 0, 0)),
        ),
        compiler_params=pltpu.CompilerParams(
            dimension_semantics=("parallel", "arbitrary"),
            vmem_limit_bytes=vmem_limit),
        cost_estimate=pl.CostEstimate(
            flops=5 * rows * _LANES,
            transcendentals=0,
            bytes_accessed=bytes_accessed),
    )(yt2d, yp2d)

    sums = jnp.sum(acc, axis=(0, 2, 3))               # tiny final reduce in JAX
    return sums[0], sums[1], sums[2]


@functools.partial(jax.jit, static_argnames=("eps", "block_rows"))
def mcc_loss(y_true, y_preds, eps=1e-7, block_rows=_DEFAULT_BLOCK_ROWS):
    """Pallas implementation of the (soft) MCC loss: 1 - MCC."""
    flat_t = y_true.reshape(-1)
    flat_p = y_preds.reshape(-1)
    n = flat_t.shape[0]
    n_main = (n // _TILE_ELEMS) * _TILE_ELEMS          # kernel-aligned prefix

    tp = jnp.float32(0.0)
    sum_t = jnp.float32(0.0)
    sum_p = jnp.float32(0.0)

    if n_main > 0:
        # Aligned prefix streams through the kernel in its native dtype.  When
        # n == n_main the reshape is a free bitcast (no wrapper-side copy).
        yt2d = (flat_t if n_main == n else flat_t[:n_main]).reshape(
            n_main // _LANES, _LANES)
        yp2d = (flat_p if n_main == n else flat_p[:n_main]).reshape(
            n_main // _LANES, _LANES)
        tp, sum_t, sum_p = _kernel_partial_sums(yt2d, yp2d, block_rows)

    if n_main < n:
        # Ragged tail (< 1024 elements): reduce in plain JAX instead of
        # materializing a padded copy of the whole tensor.
        tt = flat_t[n_main:].astype(jnp.float32)
        tpp = flat_p[n_main:].astype(jnp.float32)
        tp = tp + jnp.sum(tt * tpp)
        sum_t = sum_t + jnp.sum(tt)
        sum_p = sum_p + jnp.sum(tpp)

    n_f = jnp.float32(n)
    fp = sum_p - tp
    fn = sum_t - tp
    tn = n_f - sum_t - sum_p + tp

    numerator = tp * tn - fp * fn
    denominator = jnp.sqrt((tp + fp) * (tp + fn) * (tn + fp) * (tn + fn)) + eps
    return 1.0 - numerator / denominator


def _mcc_loss_ref(y_true, y_preds, eps=1e-7):
    """Pure-JAX reference for sanity checking."""
    yt = y_true.astype(jnp.float32).reshape(-1)
    yp = y_preds.astype(jnp.float32).reshape(-1)
    tp = jnp.sum(yt * yp)
    tn = jnp.sum((1.0 - yt) * (1.0 - yp))
    fp = jnp.sum((1.0 - yt) * yp)
    fn = jnp.sum(yt * (1.0 - yp))
    num = tp * tn - fp * fn
    den = jnp.sqrt((tp + fp) * (tp + fn) * (tn + fp) * (tn + fn)) + eps
    return 1.0 - num / den


if __name__ == "__main__":
    key = jax.random.PRNGKey(0)
    k1, k2, k3, k4, k5, k6, k7, k8 = jax.random.split(key, 8)

    # NCHW inputs, consistent with a DCGAN-style discriminator output map.
    # 2*4*16*16 = 2048 elements: fully aligned, zero-copy kernel path.
    B, C, H, W = 2, 4, 16, 16
    y_true = jax.random.bernoulli(k1, p=0.5, shape=(B, C, H, W)).astype(
        jnp.float32)
    y_preds = jax.random.uniform(k2, shape=(B, C, H, W), dtype=jnp.float32)
    loss = jax.block_until_ready(mcc_loss(y_true, y_preds))
    ref = jax.block_until_ready(_mcc_loss_ref(y_true, y_preds))
    assert jnp.allclose(loss, ref, atol=1e-5, rtol=1e-5), (loss, ref)

    # Multi-block case (small block_rows) exercising the clamped index map,
    # the pl.when-gated tail mask and (on 2-TC chips) the 2-way split.
    yt2 = jax.random.bernoulli(k3, p=0.5, shape=(2, 4, 40, 16)).astype(
        jnp.float32)
    yp2 = jax.random.uniform(k4, shape=(2, 4, 40, 16), dtype=jnp.float32)
    loss2 = jax.block_until_ready(mcc_loss(yt2, yp2, block_rows=16))
    ref2 = jax.block_until_ready(_mcc_loss_ref(yt2, yp2))
    assert jnp.allclose(loss2, ref2, atol=1e-5, rtol=1e-5), (loss2, ref2)

    # 3*7*7*7 = 1029 elements: 1024 through the kernel + 5-element JAX tail.
    yt3 = jax.random.bernoulli(k5, p=0.5, shape=(3, 7, 7, 7)).astype(
        jnp.float32)
    yp3 = jax.random.uniform(k6, shape=(3, 7, 7, 7), dtype=jnp.float32)
    loss3 = jax.block_until_ready(mcc_loss(yt3, yp3))
    ref3 = jax.block_until_ready(_mcc_loss_ref(yt3, yp3))
    assert jnp.allclose(loss3, ref3, atol=1e-5, rtol=1e-5), (loss3, ref3)

    # Tiny unaligned case (< 1024 elements): pure plain-JAX tail path.
    yt4 = jax.random.bernoulli(k7, p=0.5, shape=(2, 3, 10, 10)).astype(
        jnp.float32)
    yp4 = jax.random.uniform(k8, shape=(2, 3, 10, 10), dtype=jnp.float32)
    loss4 = jax.block_until_ready(mcc_loss(yt4, yp4))
    ref4 = jax.block_until_ready(_mcc_loss_ref(yt4, yp4))
    assert jnp.allclose(loss4, ref4, atol=1e-5, rtol=1e-5), (loss4, ref4)

    print("KERNEL_OK")
</pallas_src>

<mosaic_0001>
module attributes {stable_mosaic.version = 11 : i64} {
  func.func @_mcc_stats_kernel(%arg0: i32, %arg1: i32, %arg2: memref<16x128xf32, #tpu.memory_space<vmem>>, %arg3: memref<16x128xf32, #tpu.memory_space<vmem>>, %arg4: memref<1x3x8x128xf32, #tpu.memory_space<vmem>>) attributes {dimension_semantics = [#tpu.dimension_semantics<parallel>, #tpu.dimension_semantics<arbitrary>], iteration_bounds = array<i64: 1, 1>, scalar_prefetch = 0 : i64, scratch_operands = 0 : i64, tpu.core_type = #tpu.core_type<tc>, window_params = [{transform_indices = @transform_0, window_bounds = array<i64: 16, 128>}, {transform_indices = @transform_1, window_bounds = array<i64: 16, 128>}, {transform_indices = @transform_2, window_bounds = array<i64: 1, 3, 8, 128>}]} {
    %c0_i32 = arith.constant 0 : i32
    %0 = arith.cmpi eq, %arg1, %c0_i32 : i32
    %1 = arith.extui %0 : i1 to i32
    %c0_i32_0 = arith.constant 0 : i32
    %2 = arith.cmpi ne, %1, %c0_i32_0 : i32
    scf.if %2 {
      %cst_28 = arith.constant 0.000000e+00 : f32
      %30 = vector.broadcast %cst_28 : f32 to vector<1x3x8x128xf32>
      %c0_29 = arith.constant 0 : index
      %c0_30 = arith.constant 0 : index
      %c0_31 = arith.constant 0 : index
      %c0_32 = arith.constant 0 : index
      %31 = vector.load %arg4[%c0_29, %c0_30, %c0_31, %c0_32] : memref<1x3x8x128xf32, #tpu.memory_space<vmem>>, vector<1x3x8x128xf32>
      tpu.vector_store %arg4[%c0_29, %c0_30, %c0_31, %c0_32], %30 {strides = array<i32>} : memref<1x3x8x128xf32, #tpu.memory_space<vmem>>, vector<1x3x8x128xf32>,
    } else {
    }
    %c0 = arith.constant 0 : index
    %c0_1 = arith.constant 0 : index
    %3 = vector.load %arg2[%c0, %c0_1] : memref<16x128xf32, #tpu.memory_space<vmem>>, vector<16x128xf32>
    %c0_2 = arith.constant 0 : index
    %c0_3 = arith.constant 0 : index
    %4 = vector.load %arg3[%c0_2, %c0_3] : memref<16x128xf32, #tpu.memory_space<vmem>>, vector<16x128xf32>
    %5 = arith.mulf %3, %4 : vector<16x128xf32>
    %c0_4 = arith.constant 0 : index
    %c0_5 = arith.constant 0 : index
    %c0_6 = arith.constant 0 : index
    %c0_7 = arith.constant 0 : index
    %6 = vector.load %arg4[%c0_4, %c0_5, %c0_6, %c0_7] : memref<1x3x8x128xf32, #tpu.memory_space<vmem>>, vector<1x1x8x128xf32>
    %7 = vector.shape_cast %6 : vector<1x1x8x128xf32> to vector<8x128xf32>
    %8 = vector.shape_cast %5 : vector<16x128xf32> to vector<2x8x128xf32>
    %cst = arith.constant dense<0.000000e+00> : vector<8x128xf32>
    %9 = vector.multi_reduction <add>, %8, %cst [0] : vector<2x8x128xf32> to vector<8x128xf32>
    %10 = arith.addf %7, %9 : vector<8x128xf32>
    %c0_8 = arith.constant 0 : index
    %c0_9 = arith.constant 0 : index
    %c0_10 = arith.constant 0 : index
    %c0_11 = arith.constant 0 : index
    %11 = vector.load %arg4[%c0_8, %c0_9, %c0_10, %c0_11] : memref<1x3x8x128xf32, #tpu.memory_space<vmem>>, vector<1x1x8x128xf32>
    %12 = vector.shape_cast %11 : vector<1x1x8x128xf32> to vector<8x128xf32>
    %13 = vector.shape_cast %10 : vector<8x128xf32> to vector<1x1x8x128xf32>
    tpu.vector_store %arg4[%c0_8, %c0_9, %c0_10, %c0_11], %13 {strides = array<i32>} : memref<1x3x8x128xf32, #tpu.memory_space<vmem>>, vector<1x1x8x128xf32>,
    %c0_12 = arith.constant 0 : index
    %c1 = arith.constant 1 : index
    %c0_13 = arith.constant 0 : index
    %c0_14 = arith.constant 0 : index
    %14 = vector.load %arg4[%c0_12, %c1, %c0_13, %c0_14] : memref<1x3x8x128xf32, #tpu.memory_space<vmem>>, vector<1x1x8x128xf32>
    %15 = vector.shape_cast %14 : vector<1x1x8x128xf32> to vector<8x128xf32>
    %16 = vector.shape_cast %3 : vector<16x128xf32> to vector<2x8x128xf32>
    %cst_15 = arith.constant dense<0.000000e+00> : vector<8x128xf32>
    %17 = vector.multi_reduction <add>, %16, %cst_15 [0] : vector<2x8x128xf32> to vector<8x128xf32>
    %18 = arith.addf %15, %17 : vector<8x128xf32>
    %c0_16 = arith.constant 0 : index
    %c1_17 = arith.constant 1 : index
    %c0_18 = arith.constant 0 : index
    %c0_19 = arith.constant 0 : index
    %19 = vector.load %arg4[%c0_16, %c1_17, %c0_18, %c0_19] : memref<1x3x8x128xf32, #tpu.memory_space<vmem>>, vector<1x1x8x128xf32>
    %20 = vector.shape_cast %19 : vector<1x1x8x128xf32> to vector<8x128xf32>
    %21 = vector.shape_cast %18 : vector<8x128xf32> to vector<1x1x8x128xf32>
    tpu.vector_store %arg4[%c0_16, %c1_17, %c0_18, %c0_19], %21 {strides = array<i32>} : memref<1x3x8x128xf32, #tpu.memory_space<vmem>>, vector<1x1x8x128xf32>,
    %c0_20 = arith.constant 0 : index
    %c2 = arith.constant 2 : index
    %c0_21 = arith.constant 0 : index
    %c0_22 = arith.constant 0 : index
    %22 = vector.load %arg4[%c0_20, %c2, %c0_21, %c0_22] : memref<1x3x8x128xf32, #tpu.memory_space<vmem>>, vector<1x1x8x128xf32>
    %23 = vector.shape_cast %22 : vector<1x1x8x128xf32> to vector<8x128xf32>
    %24 = vector.shape_cast %4 : vector<16x128xf32> to vector<2x8x128xf32>
    %cst_23 = arith.constant dense<0.000000e+00> : vector<8x128xf32>
    %25 = vector.multi_reduction <add>, %24, %cst_23 [0] : vector<2x8x128xf32> to vector<8x128xf32>
    %26 = arith.addf %23, %25 : vector<8x128xf32>
    %c0_24 = arith.constant 0 : index
    %c2_25 = arith.constant 2 : index
    %c0_26 = arith.constant 0 : index
    %c0_27 = arith.constant 0 : index
    %27 = vector.load %arg4[%c0_24, %c2_25, %c0_26, %c0_27] : memref<1x3x8x128xf32, #tpu.memory_space<vmem>>, vector<1x1x8x128xf32>
    %28 = vector.shape_cast %27 : vector<1x1x8x128xf32> to vector<8x128xf32>
    %29 = vector.shape_cast %26 : vector<8x128xf32> to vector<1x1x8x128xf32>
    tpu.vector_store %arg4[%c0_24, %c2_25, %c0_26, %c0_27], %29 {strides = array<i32>} : memref<1x3x8x128xf32, #tpu.memory_space<vmem>>, vector<1x1x8x128xf32>,
    return
  }
  func.func @transform_0(%arg0: i32, %arg1: i32) -> (i32, i32) {
    %c1_i32 = arith.constant 1 : i32
    %0 = arith.muli %arg0, %c1_i32 : i32
    %1 = arith.addi %0, %arg1 : i32
    %c0_i32 = arith.constant 0 : i32
    %c0_i32_0 = arith.constant 0 : i32
    return %1, %c0_i32 : i32, i32
  }
  func.func @transform_1(%arg0: i32, %arg1: i32) -> (i32, i32) {
    %c1_i32 = arith.constant 1 : i32
    %0 = arith.muli %arg0, %c1_i32 : i32
    %1 = arith.addi %0, %arg1 : i32
    %c0_i32 = arith.constant 0 : i32
    %c0_i32_0 = arith.constant 0 : i32
    return %1, %c0_i32 : i32, i32
  }
  func.func @transform_2(%arg0: i32, %arg1: i32) -> (i32, i32, i32, i32) {
    %c0_i32 = arith.constant 0 : i32
    %c0_i32_0 = arith.constant 0 : i32
    %c0_i32_1 = arith.constant 0 : i32
    %c0_i32_2 = arith.constant 0 : i32
    return %arg0, %c0_i32, %c0_i32_0, %c0_i32_1 : i32, i32, i32, i32
  }
}

</mosaic_0001>

<bundles_post_ra>
// kernel: mcc_loss.1
= control target key start
LH: loop header
LB: loop body
LE: loop exit
PB: predicated region body
PF: predicated region fallthrough
CT: control target
= control target key end

     0   :  { %s139_s0 = inlined_call_operand.vmem [shape: f32[16,128], index: 0, kind: input, shape index: {}]   ;;  %s140_s1 = inlined_call_operand.vmem [shape: f32[16,128], index: 1, kind: input, shape index: {}]   ;;  %s141_s2 = inlined_call_operand.vmem [shape: f32[1,3,8,128], index: 2, kind: output, shape index: {}]  }
   0x1   :  { %v62_v0 = vld [vmem:[%s139_s0] sm:$0xff]  ;;  %v63_v1 = vld [vmem:[%s139_s0 + $0x8] sm:$0xff] }
   0x2   :  { %v64_v2 = vld [vmem:[%s140_s1] sm:$0xff]  ;;  %v65_v3 = vld [vmem:[%s140_s1 + $0x8] sm:$0xff]  ;;  %v74_v5 = vadd.f32 %v63_v1, %v62_v0 }
   0x3   :  { %v66_v4 = vmul.f32 %v64_v2, %v62_v0  ;;  %v67_v6 = vmul.f32 %v65_v3, %v63_v1  ;;  %v79_v7 = vadd.f32 %v65_v3, %v64_v2 }
   0x4   :  { %99 = vst [vmem:[%s141_s2 + $0x8] sm:$0xff] %v74_v5 }
   0x5   :  { %v69_v8 = vadd.f32 %v67_v6, %v66_v4  ;;  %101 = vst [vmem:[%s141_s2 + $0x10] sm:$0xff] %v79_v7 }
   0x7   :  { %71 = vst [vmem:[%s141_s2] sm:$0xff] %v69_v8 }

</bundles_post_ra>
